<compile_context>
chip_gen: v5e
topology: v5e:2x2
jax: 0.10.0
libtpu: 0.0.40
codegen_flags: <defaults>
</compile_context>

<pallas_src>
import functools

import jax
import jax.numpy as jnp
from jax.experimental import pallas as pl
from jax.experimental.pallas import tpu as pltpu

IGNORE_LABEL = 255


def _round_up(x, m):
    return ((x + m - 1) // m) * m


def _choose_tile(S, C, logits_itemsize, max_tile):
    """Spatial (lane) tile: as large as possible under a conservative VMEM cap."""
    vmem_budget = 8 * 1024 * 1024  # double-buffered block footprint target
    per_col = 2 * (C * logits_itemsize + 4)  # 2x-buffered logits col + i32 target
    tile = min(max_tile, max(128, vmem_budget // per_col))
    tile = min(tile, _round_up(S, 128))
    tile = max(128, (tile // 128) * 128)
    return tile


def _ce_kernel(target_ref, logits_ref, loss_ref, cnt_ref, acc_loss, acc_cnt,
               *, ignore_classes):
    """Per-tile cross entropy, classes on the sublane axis.

    target_ref: (1, 1, TS) int32    logits_ref: (1, C, TS)
    loss_ref, cnt_ref: (1, 1, 1) f32 per-partial outputs
    acc_loss, acc_cnt: (1, TS) f32 VMEM scratch accumulators
    Grid: (P, N, spatial_blocks_per_partial)
    """
    n = pl.program_id(1)
    s = pl.program_id(2)
    is_first = jnp.logical_and(n == 0, s == 0)
    is_last = jnp.logical_and(n == pl.num_programs(1) - 1,
                              s == pl.num_programs(2) - 1)

    @pl.when(is_first)
    def _():
        acc_loss[...] = jnp.zeros_like(acc_loss)
        acc_cnt[...] = jnp.zeros_like(acc_cnt)

    logits = logits_ref[0].astype(jnp.float32)       # (C, TS)
    tgt = target_ref[0]                              # (1, TS) int32

    # log-sum-exp over the class (sublane) axis.
    m = jnp.max(logits, axis=0, keepdims=True)                       # (1, TS)
    lse = jnp.log(jnp.sum(jnp.exp(logits - m), axis=0, keepdims=True)) + m

    # Gather logit of the target class via masked sum (no dynamic gather on TPU).
    class_ids = jax.lax.broadcasted_iota(jnp.int32, logits.shape, 0)  # (C, TS)
    picked = jnp.sum(jnp.where(class_ids == tgt, logits, 0.0),
                     axis=0, keepdims=True)                           # (1, TS)

    # In-kernel ignore mask: sentinel 255 (also used for padded columns) plus
    # the statically-known ignore classes.
    # TODO(synk): if C > 255, class id 255 collides with the ignore sentinel
    # (same limitation as the PyTorch original).
    valid = tgt != IGNORE_LABEL
    for cls in ignore_classes:
        valid = jnp.logical_and(valid, tgt != cls)
    validf = valid.astype(jnp.float32)                                # (1, TS)

    acc_loss[...] += (lse - picked) * validf
    acc_cnt[...] += validf

    @pl.when(is_last)
    def _():
        loss_ref[...] = jnp.reshape(jnp.sum(acc_loss[...]), (1, 1, 1))
        cnt_ref[...] = jnp.reshape(jnp.sum(acc_cnt[...]), (1, 1, 1))


@functools.partial(
    jax.jit,
    static_argnames=("ignore_index", "reduction", "max_tile_s", "num_partials"))
def semantic_consistency(inp, target, ignore_index=(), reduction="mean",
                         max_tile_s=2048, num_partials=2):
    """JAX / Pallas equivalent of SemanticConsistency.forward.

    inp:    (N, C) or (N, C, d1, ..., dK) float logits
    target: (N,)   or (N, d1, ..., dK)    integer class labels
    """
    if reduction not in ("mean", "sum"):
        # TODO(synk): reduction='none' needs per-element outputs; only the
        # scalar reductions ('mean', 'sum') are implemented in the kernel path.
        raise NotImplementedError("reduction='none' not implemented")

    target = target.astype(jnp.int32)

    if inp.ndim == 2:
        # Classification case: put samples on the lane axis, classes on sublanes.
        # (Small transpose; the big K-dim path below needs no transpose at all.)
        n_samples, C = inp.shape
        logits_3d = inp.T.reshape(1, C, n_samples)
        target_3d = target.reshape(1, 1, n_samples)
        N, S = 1, n_samples
    else:
        N, C = inp.shape[0], inp.shape[1]
        S = 1
        for d in inp.shape[2:]:
            S *= d
        logits_3d = inp.reshape(N, C, S)        # free contiguous view, no transpose
        target_3d = target.reshape(N, 1, S)

    itemsize = jnp.dtype(inp.dtype).itemsize
    tile = _choose_tile(S, C, itemsize, max_tile_s)

    n_blocks = -(-S // tile)
    P = max(1, min(num_partials, n_blocks))     # per-TensorCore partials
    n_blocks = _round_up(n_blocks, P)
    S_pad = n_blocks * tile
    if S_pad != S:
        logits_3d = jnp.pad(logits_3d, ((0, 0), (0, 0), (0, S_pad - S)))
        target_3d = jnp.pad(target_3d, ((0, 0), (0, 0), (0, S_pad - S)),
                            constant_values=IGNORE_LABEL)
    nspp = n_blocks // P                        # spatial blocks per partial

    kernel = functools.partial(
        _ce_kernel, ignore_classes=tuple(int(c) for c in ignore_index))

    loss_p, cnt_p = pl.pallas_call(
        kernel,
        out_shape=(
            jax.ShapeDtypeStruct((P, 1, 1), jnp.float32),
            jax.ShapeDtypeStruct((P, 1, 1), jnp.float32),
        ),
        grid_spec=pltpu.PrefetchScalarGridSpec(
            num_scalar_prefetch=0,
            grid=(P, N, nspp),
            in_specs=[
                pl.BlockSpec((1, 1, tile), lambda p, n, s: (n, 0, p * nspp + s)),
                pl.BlockSpec((1, C, tile), lambda p, n, s: (n, 0, p * nspp + s)),
            ],
            out_specs=[
                pl.BlockSpec((1, 1, 1), lambda p, n, s: (p, 0, 0)),
                pl.BlockSpec((1, 1, 1), lambda p, n, s: (p, 0, 0)),
            ],
            scratch_shapes=[
                pltpu.VMEM((1, tile), jnp.float32),
                pltpu.VMEM((1, tile), jnp.float32),
            ],
        ),
        compiler_params=pltpu.CompilerParams(
            dimension_semantics=("parallel", "arbitrary", "arbitrary"),
            vmem_limit_bytes=32 * 1024 * 1024,
        ),
    )(target_3d, logits_3d)

    loss_sum = jnp.sum(loss_p)
    valid_cnt = jnp.sum(cnt_p)

    if reduction == "mean":
        # NaN if no valid targets (matches the previous version; PyTorch returns
        # nan as well for an all-ignored batch with this formulation).
        return loss_sum / valid_cnt
    return loss_sum


def _reference(inp, target, ignore_index=()):
    """Pure-JAX reference for verification."""
    target = target.astype(jnp.int32)
    for class_idx in ignore_index:
        target = jnp.where(target == class_idx, IGNORE_LABEL, target)
    if inp.ndim > 2:
        C = inp.shape[1]
        perm = (0,) + tuple(range(2, inp.ndim)) + (1,)
        logits = jnp.transpose(inp, perm).reshape(-1, C)
    else:
        logits = inp
    tgt = target.reshape(-1)
    logp = jax.nn.log_softmax(logits.astype(jnp.float32), axis=-1)
    picked = jnp.take_along_axis(
        logp, jnp.clip(tgt, 0, logits.shape[1] - 1)[:, None], axis=-1)[:, 0]
    valid = (tgt != IGNORE_LABEL).astype(jnp.float32)
    return jnp.sum(-picked * valid) / jnp.sum(valid)


if __name__ == "__main__":
    key = jax.random.PRNGKey(0)
    k1, k2, k3, k4 = jax.random.split(key, 4)

    # K-dimensional case: segmentation-style logits (N, C, H, W), targets (N, H, W).
    N, C, H, W = 2, 4, 16, 16
    x = jax.random.normal(k1, (N, C, H, W), dtype=jnp.float32)
    t = jax.random.randint(k2, (N, H, W), 0, C, dtype=jnp.int32)
    ignore = (1,)  # classes to ignore, as in SemanticConsistency(ignore_index=(1,))

    out = semantic_consistency(x, t, ignore_index=ignore, reduction="mean")
    out = jax.block_until_ready(out)
    ref = _reference(x, t, ignore_index=ignore)
    assert jnp.allclose(out, ref, atol=1e-5, rtol=1e-5), (out, ref)

    # 2-D classification case: logits (N, C), targets (N,).
    x2 = jax.random.normal(k3, (8, 5), dtype=jnp.float32)
    t2 = jax.random.randint(k4, (8,), 0, 5, dtype=jnp.int32)
    out2 = semantic_consistency(x2, t2, ignore_index=(), reduction="mean")
    out2 = jax.block_until_ready(out2)
    ref2 = _reference(x2, t2, ignore_index=())
    assert jnp.allclose(out2, ref2, atol=1e-5, rtol=1e-5), (out2, ref2)

    print("KERNEL_OK")
</pallas_src>

<mosaic_0001>
module attributes {stable_mosaic.version = 11 : i64} {
  func.func @_ce_kernel(%arg0: i32, %arg1: i32, %arg2: i32, %arg3: memref<1x1x256xi32, #tpu.memory_space<vmem>>, %arg4: memref<1x4x256xf32, #tpu.memory_space<vmem>>, %arg5: memref<1x1x1xf32, #tpu.memory_space<vmem>>, %arg6: memref<1x1x1xf32, #tpu.memory_space<vmem>>, %arg7: memref<1x256xf32, #tpu.memory_space<vmem>>, %arg8: memref<1x256xf32, #tpu.memory_space<vmem>>) attributes {dimension_semantics = [#tpu.dimension_semantics<parallel>, #tpu.dimension_semantics<arbitrary>, #tpu.dimension_semantics<arbitrary>], iteration_bounds = array<i64: 1, 2, 1>, scalar_prefetch = 0 : i64, scratch_operands = 2 : i64, tpu.core_type = #tpu.core_type<tc>, window_params = [{transform_indices = @transform_0, window_bounds = array<i64: 1, 1, 256>}, {transform_indices = @transform_1, window_bounds = array<i64: 1, 4, 256>}, {transform_indices = @transform_2, window_bounds = array<i64: 1, 1, 1>}, {transform_indices = @transform_3, window_bounds = array<i64: 1, 1, 1>}]} {
    %c0_i32 = arith.constant 0 : i32
    %0 = arith.cmpi eq, %arg1, %c0_i32 : i32
    %c0_i32_0 = arith.constant 0 : i32
    %1 = arith.cmpi eq, %arg2, %c0_i32_0 : i32
    %2 = arith.andi %0, %1 : i1
    %c1_i32 = arith.constant 1 : i32
    %3 = arith.cmpi eq, %arg1, %c1_i32 : i32
    %c0_i32_1 = arith.constant 0 : i32
    %4 = arith.cmpi eq, %arg2, %c0_i32_1 : i32
    %5 = arith.andi %3, %4 : i1
    %6 = arith.extui %2 : i1 to i32
    %c0_i32_2 = arith.constant 0 : i32
    %7 = arith.cmpi ne, %6, %c0_i32_2 : i32
    scf.if %7 {
      %cst_21 = arith.constant 0.000000e+00 : f32
      %45 = vector.broadcast %cst_21 : f32 to vector<1x256xf32>
      %c0_22 = arith.constant 0 : index
      %c0_23 = arith.constant 0 : index
      %46 = vector.load %arg7[%c0_22, %c0_23] : memref<1x256xf32, #tpu.memory_space<vmem>>, vector<1x256xf32>
      tpu.vector_store %arg7[%c0_22, %c0_23], %45 {strides = array<i32>} : memref<1x256xf32, #tpu.memory_space<vmem>>, vector<1x256xf32>,
      %cst_24 = arith.constant 0.000000e+00 : f32
      %47 = vector.broadcast %cst_24 : f32 to vector<1x256xf32>
      %c0_25 = arith.constant 0 : index
      %c0_26 = arith.constant 0 : index
      %48 = vector.load %arg8[%c0_25, %c0_26] : memref<1x256xf32, #tpu.memory_space<vmem>>, vector<1x256xf32>
      tpu.vector_store %arg8[%c0_25, %c0_26], %47 {strides = array<i32>} : memref<1x256xf32, #tpu.memory_space<vmem>>, vector<1x256xf32>,
    } else {
    }
    %c0 = arith.constant 0 : index
    %c0_3 = arith.constant 0 : index
    %c0_4 = arith.constant 0 : index
    %8 = vector.load %arg4[%c0, %c0_3, %c0_4] : memref<1x4x256xf32, #tpu.memory_space<vmem>>, vector<1x4x256xf32>
    %9 = vector.shape_cast %8 : vector<1x4x256xf32> to vector<4x256xf32>
    %c0_5 = arith.constant 0 : index
    %c0_6 = arith.constant 0 : index
    %c0_7 = arith.constant 0 : index
    %10 = vector.load %arg3[%c0_5, %c0_6, %c0_7] : memref<1x1x256xi32, #tpu.memory_space<vmem>>, vector<1x1x256xi32>
    %11 = vector.shape_cast %10 : vector<1x1x256xi32> to vector<1x256xi32>
    %cst = arith.constant dense<0xFF800000> : vector<256xf32>
    %12 = vector.multi_reduction <maximumf>, %9, %cst [0] : vector<4x256xf32> to vector<256xf32>
    %13 = vector.shape_cast %12 : vector<256xf32> to vector<1x256xf32>
    %14 = vector.broadcast %13 : vector<1x256xf32> to vector<4x256xf32>
    %15 = arith.subf %9, %14 : vector<4x256xf32>
    %16 = math.exp %15 : vector<4x256xf32>
    %cst_8 = arith.constant dense<0.000000e+00> : vector<256xf32>
    %17 = vector.multi_reduction <add>, %16, %cst_8 [0] : vector<4x256xf32> to vector<256xf32>
    %18 = vector.shape_cast %17 : vector<256xf32> to vector<1x256xf32>
    %19 = math.log %18 : vector<1x256xf32>
    %20 = arith.addf %19, %13 : vector<1x256xf32>
    %21 = tpu.iota {dimensions = array<i32: 0>} : vector<4x256xi32>
    %22 = vector.broadcast %11 : vector<1x256xi32> to vector<4x256xi32>
    %23 = arith.cmpi eq, %21, %22 : vector<4x256xi32>
    %cst_9 = arith.constant 0.000000e+00 : f32
    %24 = vector.broadcast %cst_9 : f32 to vector<4x256xf32>
    %25 = arith.select %23, %9, %24 : vector<4x256xi1>, vector<4x256xf32>
    %cst_10 = arith.constant dense<0.000000e+00> : vector<256xf32>
    %26 = vector.multi_reduction <add>, %25, %cst_10 [0] : vector<4x256xf32> to vector<256xf32>
    %27 = vector.shape_cast %26 : vector<256xf32> to vector<1x256xf32>
    %c255_i32 = arith.constant 255 : i32
    %28 = vector.broadcast %c255_i32 : i32 to vector<1x256xi32>
    %29 = arith.cmpi ne, %11, %28 : vector<1x256xi32>
    %c1_i32_11 = arith.constant 1 : i32
    %30 = vector.broadcast %c1_i32_11 : i32 to vector<1x256xi32>
    %31 = arith.cmpi ne, %11, %30 : vector<1x256xi32>
    %32 = arith.andi %29, %31 : vector<1x256xi1>
    %33 = arith.extui %32 : vector<1x256xi1> to vector<1x256xi32>
    %34 = arith.sitofp %33 : vector<1x256xi32> to vector<1x256xf32>
    %c0_12 = arith.constant 0 : index
    %c0_13 = arith.constant 0 : index
    %35 = vector.load %arg7[%c0_12, %c0_13] : memref<1x256xf32, #tpu.memory_space<vmem>>, vector<1x256xf32>
    %36 = arith.subf %20, %27 : vector<1x256xf32>
    %37 = arith.mulf %36, %34 : vector<1x256xf32>
    %38 = arith.addf %35, %37 : vector<1x256xf32>
    %c0_14 = arith.constant 0 : index
    %c0_15 = arith.constant 0 : index
    %39 = vector.load %arg7[%c0_14, %c0_15] : memref<1x256xf32, #tpu.memory_space<vmem>>, vector<1x256xf32>
    tpu.vector_store %arg7[%c0_14, %c0_15], %38 {strides = array<i32>} : memref<1x256xf32, #tpu.memory_space<vmem>>, vector<1x256xf32>,
    %c0_16 = arith.constant 0 : index
    %c0_17 = arith.constant 0 : index
    %40 = vector.load %arg8[%c0_16, %c0_17] : memref<1x256xf32, #tpu.memory_space<vmem>>, vector<1x256xf32>
    %41 = arith.addf %40, %34 : vector<1x256xf32>
    %c0_18 = arith.constant 0 : index
    %c0_19 = arith.constant 0 : index
    %42 = vector.load %arg8[%c0_18, %c0_19] : memref<1x256xf32, #tpu.memory_space<vmem>>, vector<1x256xf32>
    tpu.vector_store %arg8[%c0_18, %c0_19], %41 {strides = array<i32>} : memref<1x256xf32, #tpu.memory_space<vmem>>, vector<1x256xf32>,
    %43 = arith.extui %5 : i1 to i32
    %c0_i32_20 = arith.constant 0 : i32
    %44 = arith.cmpi ne, %43, %c0_i32_20 : i32
    scf.if %44 {
      %c0_21 = arith.constant 0 : index
      %c0_22 = arith.constant 0 : index
      %45 = vector.load %arg7[%c0_21, %c0_22] : memref<1x256xf32, #tpu.memory_space<vmem>>, vector<1x256xf32>
      %46 = vector.shape_cast %45 : vector<1x256xf32> to vector<1x1x256xf32>
      %cst_23 = arith.constant dense<0.000000e+00> : vector<1xf32>
      %47 = vector.multi_reduction <add>, %46, %cst_23 [1, 2] : vector<1x1x256xf32> to vector<1xf32>
      %48 = vector.shape_cast %47 : vector<1xf32> to vector<1x1x1xf32>
      %49 = vector.extract %48[0, 0, 0] : f32 from vector<1x1x1xf32>
      %50 = vector.broadcast %49 : f32 to vector<1x1x1xf32>
      %c0_24 = arith.constant 0 : index
      %c0_25 = arith.constant 0 : index
      %c0_26 = arith.constant 0 : index
      %51 = vector.load %arg5[%c0_24, %c0_25, %c0_26] : memref<1x1x1xf32, #tpu.memory_space<vmem>>, vector<1x1x1xf32>
      tpu.vector_store %arg5[%c0_24, %c0_25, %c0_26], %50 {strides = array<i32>} : memref<1x1x1xf32, #tpu.memory_space<vmem>>, vector<1x1x1xf32>,
      %c0_27 = arith.constant 0 : index
      %c0_28 = arith.constant 0 : index
      %52 = vector.load %arg8[%c0_27, %c0_28] : memref<1x256xf32, #tpu.memory_space<vmem>>, vector<1x256xf32>
      %53 = vector.shape_cast %52 : vector<1x256xf32> to vector<1x1x256xf32>
      %cst_29 = arith.constant dense<0.000000e+00> : vector<1xf32>
      %54 = vector.multi_reduction <add>, %53, %cst_29 [1, 2] : vector<1x1x256xf32> to vector<1xf32>
      %55 = vector.shape_cast %54 : vector<1xf32> to vector<1x1x1xf32>
      %56 = vector.extract %55[0, 0, 0] : f32 from vector<1x1x1xf32>
      %57 = vector.broadcast %56 : f32 to vector<1x1x1xf32>
      %c0_30 = arith.constant 0 : index
      %c0_31 = arith.constant 0 : index
      %c0_32 = arith.constant 0 : index
      %58 = vector.load %arg6[%c0_30, %c0_31, %c0_32] : memref<1x1x1xf32, #tpu.memory_space<vmem>>, vector<1x1x1xf32>
      tpu.vector_store %arg6[%c0_30, %c0_31, %c0_32], %57 {strides = array<i32>} : memref<1x1x1xf32, #tpu.memory_space<vmem>>, vector<1x1x1xf32>,
    } else {
    }
    return
  }
  func.func @transform_0(%arg0: i32, %arg1: i32, %arg2: i32) -> (i32, i32, i32) {
    %c1_i32 = arith.constant 1 : i32
    %0 = arith.muli %arg0, %c1_i32 : i32
    %1 = arith.addi %0, %arg2 : i32
    %c0_i32 = arith.constant 0 : i32
    %c0_i32_0 = arith.constant 0 : i32
    return %arg1, %c0_i32, %1 : i32, i32, i32
  }
  func.func @transform_1(%arg0: i32, %arg1: i32, %arg2: i32) -> (i32, i32, i32) {
    %c1_i32 = arith.constant 1 : i32
    %0 = arith.muli %arg0, %c1_i32 : i32
    %1 = arith.addi %0, %arg2 : i32
    %c0_i32 = arith.constant 0 : i32
    %c0_i32_0 = arith.constant 0 : i32
    return %arg1, %c0_i32, %1 : i32, i32, i32
  }
  func.func @transform_2(%arg0: i32, %arg1: i32, %arg2: i32) -> (i32, i32, i32) {
    %c0_i32 = arith.constant 0 : i32
    %c0_i32_0 = arith.constant 0 : i32
    %c0_i32_1 = arith.constant 0 : i32
    return %arg0, %c0_i32, %c0_i32_0 : i32, i32, i32
  }
  func.func @transform_3(%arg0: i32, %arg1: i32, %arg2: i32) -> (i32, i32, i32) {
    %c0_i32 = arith.constant 0 : i32
    %c0_i32_0 = arith.constant 0 : i32
    %c0_i32_1 = arith.constant 0 : i32
    return %arg0, %c0_i32, %c0_i32_0 : i32, i32, i32
  }
}

</mosaic_0001>

<bundles_post_ra>
// kernel: semantic_consistency.1
= control target key start
LH: loop header
LB: loop body
LE: loop exit
PB: predicated region body
PF: predicated region fallthrough
CT: control target
= control target key end

     0   :  { %9 = vsyncpa [#allocation5], 0  ;;  %s807_s0 = inlined_call_operand.vmem [shape: s32[2,1,256], index: 0, kind: input, shape index: {}]   ;;  %s808_s1 = inlined_call_operand.vmem [shape: f32[2,4,256], index: 1, kind: input, shape index: {}]   ;;  %s809_s2 = inlined_call_operand.hbm [shape: f32[1,1,1], index: 2, kind: output, shape index: {0}]   ;;  %s810_s3 = inlined_call_operand.hbm [shape: f32[1,1,1], index: 3, kind: output, shape index: {1}]  }
   0x1   :  { %10 = vsyncpa [#allocation7], 0  ;;  %s710_s12 = smov 0   ;;  %s712_s13 = smov 0  }
   0x2   :  { %s714_s14 = smov 0  }
   0x3 LB: > { %s529_s15 = sadd.s32 4294967295, %s684_s14   ;;  %s31_s16 = sadd.s32 1, %s680_s13  ;;  %s684_s14 = sphi %s714_s14, %s16_s14   ;;  %s680_s13 = sphi %s712_s13, %s815_s13   ;;  %s676_s12 = sphi %s710_s12, %s814_s12  }
   0x4   : > { %p33_p0 = scmp.ge.s32.totalorder %s31_s16, 2  ;;  %p532_p1 = scmp.ge.s32.totalorder %s684_s14, 1 }
   0x5   : > { %p192_p2 = scmp.lt.s32.totalorder %s684_s14, 3 }
   0x6   : > { %s817_s16 = smov (%p33_p0, %s31_s16), 0 }
   0x7   : > { %p193_p3 = pnand %p532_p1, %p192_p2 }
   0x8   : > { %p227_p4 = scmp.lt.s32.totalorder (!%p193_p3), %s676_s12, 1  ;;  %p248_p5 = scmp.eq.s32.totalorder (!%p193_p3), %s676_s12, 0 }
   0x9   : > { %196 = sbr.rel (%p193_p3) target bundleno = 309 (0x135), region = 28  ;;  %p252_p6 = scmp.eq.s32.totalorder (!%p193_p3), %s676_s12, 1 }
   0xe   : > { %s228_s17 = scalar_select %p227_p4, %s676_s12, 1  ;;  %v257_v0 = vlaneseq (%p248_p5)  ;;  %v686_v1 = vmov (%p248_p5), 0.0  }
   0xf   : > { %256 = sbr.rel (!%p248_p5) target bundleno = 20 (0x14), region = 32 }
  0x10   : > { %s533_s18 = sshll.u32 %s228_s17, 1  ;;  %s545_s19 = sshll.u32 %s228_s17, 3  ;;  %vm259_vm0 = vcmp.lt.s32.totalorder (%p248_p5), %v257_v0, 256 }
  0x11   : > { %s738_s22 = scalar_lea.vmem %s807_s0, %s533_s18  ;;  %s245_s25 = scalar_lea.vmem %s808_s1, %s545_s19  ;;  %261 = vst.msk [vmem:[#allocation2] sm:$0x3] (%p248_p5), %vm259_vm0, %v686_v1 }
  0x12   : > { %262 = vst.msk [vmem:[#allocation3] sm:$0x3] (%p248_p5), %vm259_vm0, %v686_v1 }
  0x14 PF: > { %v263_v2 = vld [vmem:[%s245_s25] sm:$0xff]  ;;  %vm271_vm1 = vcmask 1043456   ;;  %v320_v25 = vlaneseq  ;;  %v687_v35 = vmov 0.0   ;;  %vm365_vm8 = vcmask 1040384  }
  0x15   : > { %266 = vst [vmem:[#allocation1] ss:$2 sm:$0xff] %v263_v2  ;;  %v264_v24 = vld [vmem:[%s738_s22] sm:$0x3]  ;;  %vm398_vm9 = vcmask (%p252_p6), 0  }
  0x16   : > { %vm347_vm2 = vcmp.ne.s32.totalorder %v264_v24, 255  ;;  %vm348_vm3 = vcmp.ne.s32.totalorder %v264_v24, 1  ;;  %v321_v26 = vshrl.u32 %v320_v25, 7  ;;  %v322_v31 = vperm.slane %v264_v24, 0 }
  0x17   : > { %vm349_vm4 = vmand %vm347_vm2, %vm348_vm3  ;;  %v323_v32 = vperm.slane %v264_v24, 1  ;;  %vm755_vm5 = vcmp.lt.s32.totalorder %v320_v25, 256 }
  0x18   : > { %v538_v36 = vsel %vm349_vm4, 1.0, %v687_v35  ;;  %vm324_vm6 = vcmp.eq.s32.totalorder %v321_v26, %v322_v31 }
  0x19   : > { %v374_v38 = vld [vmem:[#allocation3] sm:$0x3]  ;;  %vm325_vm7 = vcmp.eq.s32.totalorder %v321_v26, %v323_v32 }
  0x1a   : > { %v375_v39 = vadd.f32 %v538_v36, %v374_v38 }
  0x1c   : > { %v267_v3 = vld.sshfl [vmem:[#allocation1] sm:$0xff pattern:$0x75316420]  ;;  %v268_v4 = vld.sshfl [vmem:[#allocation1 + $0x8] sm:$0xff pattern:$0x75316420] }
  0x1d   : > { %v272_v5 = vsel %vm271_vm1, %v267_v3, -inf  ;;  %v279_v6 = vsel %vm271_vm1, %v268_v4, -inf  ;;  %376 = vst.msk [vmem:[#allocation3] sm:$0x3] %vm755_vm5, %v375_v39 }
  0x1e   : > { %v273_v7 = vrot.slane %v272_v5, 4  ;;  %v280_v8 = vrot.slane %v279_v6, 4 }
  0x20   : > { %v274_v9 = vmax.f32 %v272_v5, %v273_v7  ;;  %v281_v10 = vmax.f32 %v279_v6, %v280_v8 }
  0x22   : > { %v275_v11 = vrot.slane %v274_v9, 2  ;;  %v282_v12 = vrot.slane %v281_v10, 2 }
  0x24   : > { %v276_v13 = vmax.f32 %v274_v9, %v275_v11  ;;  %v283_v14 = vmax.f32 %v281_v10, %v282_v12  ;;  %v357_v10 = vperm.slane %v538_v36, 1 }
  0x26   : > { %v277_v15 = vrot.slane %v276_v13, 1  ;;  %v284_v16 = vrot.slane %v283_v14, 1 }
  0x28   : > { %v745_v17 = vmax.f32 %v283_v14, %v284_v16  ;;  %v747_v18 = vmax.f32 %v276_v13, %v277_v15  ;;  %v356_v13 = vperm.slane %v538_v36, 0  ;;  %v352_v15 = vld [vmem:[#allocation2] sm:$0x3] }
  0x2a   : > { %v288_v19 = vrot.slane %v745_v17, 4 }
  0x2c   : > { %v289_v20 = vsel %vm271_vm1, %v747_v18, %v288_v19 }
  0x2d   : > { %v291_v21 = vsub.f32 %v263_v2, %v289_v20 }
  0x2f   : > { %v292_v22 = vmul.f32 1.442695, %v291_v21 }
  0x31   : > { %592 = vpow2.f32 %v292_v22 }
  0x37   : > { %v593_v23 = vpop.eup %592 }
  0x38   : > { %295 = vst [vmem:[#allocation1] ss:$2 sm:$0xff] %v593_v23 }
  0x3f   : > { %v296_v27 = vld.sshfl [vmem:[#allocation1] sm:$0xff pattern:$0x75316420]  ;;  %v297_v28 = vld.sshfl [vmem:[#allocation1 + $0x8] sm:$0xff pattern:$0x75316420] }
  0x40   : > { %v300_v29 = vsel %vm271_vm1, %v296_v27, 0.0  ;;  %v307_v30 = vsel %vm271_vm1, %v297_v28, 0.0  ;;  %326 = vst [vmem:[#allocation1] ss:$2 sm:$0xff] %v263_v2 }
  0x41   : > { %v301_v33 = vrot.slane %v300_v29, 4  ;;  %v308_v34 = vrot.slane %v307_v30, 4 }
  0x43   : > { %v302_v40 = vadd.f32 %v301_v33, %v300_v29  ;;  %v309_v41 = vadd.f32 %v308_v34, %v307_v30 }
  0x45   : > { %v303_v42 = vrot.slane %v302_v40, 2  ;;  %v310_v43 = vrot.slane %v309_v41, 2 }
  0x47   : > { %v304_v44 = vadd.f32 %v303_v42, %v302_v40  ;;  %v311_v45 = vadd.f32 %v310_v43, %v309_v41  ;;  %v327_v46 = vld.sshfl [vmem:[#allocation1] sm:$0xff pattern:$0x75316420]  ;;  %v328_v47 = vld.sshfl [vmem:[#allocation1 + $0x8] sm:$0xff pattern:$0x75316420] }
  0x48   : > { %v331_v48 = vsel %vm324_vm6, %v327_v46, 0.0  ;;  %v332_v49 = vsel %vm325_vm7, %v328_v47, 0.0 }
  0x49   : > { %v305_v50 = vrot.slane %v304_v44, 1  ;;  %v312_v51 = vrot.slane %v311_v45, 1  ;;  %v333_v52 = vsel %vm271_vm1, %v331_v48, 0.0  ;;  %v340_v53 = vsel %vm271_vm1, %v332_v49, 0.0 }
  0x4a   : > { %v334_v54 = vrot.slane %v333_v52, 4  ;;  %v341_v55 = vrot.slane %v340_v53, 4 }
  0x4b   : > { %v306_v56 = vadd.f32 %v305_v50, %v304_v44  ;;  %v313_v57 = vadd.f32 %v312_v51, %v311_v45 }
  0x4c   : > { %v335_v58 = vadd.f32 %v334_v54, %v333_v52  ;;  %v342_v59 = vadd.f32 %v341_v55, %v340_v53 }
  0x4d   : > { %594 = vlog2.f32 %v306_v56 }
  0x4e   : > { %596 = vlog2.f32 %v313_v57  ;;  %v336_v60 = vrot.slane %v335_v58, 2  ;;  %v343_v61 = vrot.slane %v342_v59, 2 }
  0x50   : > { %v337_v62 = vadd.f32 %v336_v60, %v335_v58  ;;  %v344_v63 = vadd.f32 %v343_v61, %v342_v59 }
  0x52   : > { %v338_v1 = vrot.slane %v337_v62, 1  ;;  %v345_v2 = vrot.slane %v344_v63, 1 }
  0x53   : > { %v595_v0 = vpop.eup %594 }
  0x54   : > { %v597_v3 = vpop.eup %596  ;;  %v315_v4 = vmul.f32 0.6931472, %v595_v0  ;;  %v339_v8 = vadd.f32 %v338_v1, %v337_v62  ;;  %v346_v9 = vadd.f32 %v345_v2, %v344_v63 }
  0x55   : > { %v317_v5 = vmul.f32 0.6931472, %v597_v3 }
  0x56   : > { %v318_v6 = vadd.f32 %v315_v4, %v747_v18  ;;  %v400_v18 = vld [vmem:[#allocation3] sm:$0x3] (%p252_p6) }
  0x57   : > { %v319_v7 = vadd.f32 %v317_v5, %v745_v17  ;;  %v402_v26 = vperm.slane (%p252_p6), %v400_v18, 0  ;;  %v403_v27 = vperm.slane (%p252_p6), %v400_v18, 1 }
  0x58   : > { %v353_v11 = vsub.f32 %v318_v6, %v339_v8 }
  0x59   : > { %v354_v12 = vsub.f32 %v319_v7, %v346_v9  ;;  %v406_v29 = vsel (%p252_p6), %vm365_vm8, %v402_v26, 0.0  ;;  %v407_v30 = vsel (%p252_p6), %vm365_vm8, %v403_v27, 0.0 }
  0x5a   : > { %v360_v16 = vmul.f32 %v356_v13, %v353_v11  ;;  %v408_v31 = vadd.f32 (%p252_p6), %v407_v30, %v406_v29 }
  0x5b   : > { %v361_v14 = vmul.f32 %v357_v10, %v354_v12 }
  0x5d   : > { %v364_v19 = vrot.slane %v361_v14, 7 }
  0x5e   : > { %378 = sbr.rel (!%p252_p6) target bundleno = 299 (0x12b), region = 36 }
  0x5f   : > { %v366_v20 = vsel %vm365_vm8, %v360_v16, %v364_v19 }
  0x60   : > { %v368_v21 = vadd.f32 %v366_v20, %v352_v15 }
  0x62   : > { %373 = vst.msk [vmem:[#allocation2] sm:$0x3] %vm755_vm5, %v368_v21 }
  0x69   : > { %v379_v17 = vld [vmem:[#allocation2] sm:$0x3] }
  0x6a   : > { %v381_v22 = vperm.slane %v379_v17, 0  ;;  %v382_v23 = vperm.slane %v379_v17, 1 }
  0x6c   : > { %v385_v24 = vsel %vm365_vm8, %v381_v22, 0.0  ;;  %v386_v25 = vsel %vm365_vm8, %v382_v23, 0.0 }
  0x6d   : > { %v387_v28 = vadd.f32 %v386_v25, %v385_v24 }
  0x6f   : > { %388 = vadd.xlane.f32.xlu0 %v387_v28 }
  0x77   : > { %409 = vadd.xlane.f32.xlu0 %v408_v31 }
  0xe2   : > { %v389_v32 = vpop.xlane.xlu0 %388 }
  0xe3   : > { %v390_v33 = vrot.slane %v389_v32, 4 }
  0xe5   : > { %v391_v34 = vadd.f32 %v390_v33, %v389_v32 }
  0xe7   : > { %v392_v35 = vrot.slane %v391_v34, 2 }
  0xe9   : > { %v393_v36 = vadd.f32 %v392_v35, %v391_v34 }
  0xea   : > { %v410_v37 = vpop.xlane.xlu0 %409 }
  0xeb   : > { %v411_v38 = vrot.slane %v410_v37, 4  ;;  %v394_v39 = vrot.slane %v393_v36, 1 }
  0xed   : > { %v412_v40 = vadd.f32 %v411_v38, %v410_v37  ;;  %v395_v41 = vadd.f32 %v394_v39, %v393_v36 }
  0xef   : > { %v413_v42 = vrot.slane %v412_v40, 2  ;;  %548 = vpush %v395_v41 }
  0xf1   : > { %v414_v43 = vadd.f32 %v413_v42, %v412_v40 }
  0xf3   : > { %v415_v44 = vrot.slane %v414_v43, 1 }
  0xf5   : > { %v416_v45 = vadd.f32 %v415_v44, %v414_v43 }
  0xf7   : > { %550 = vpush %v416_v45 }
 0x120   : > { %s549_s26 = spop %548 }
 0x121   : > { %v397_v46 = vstv %s549_s26 }
 0x122   : > { %399 = vst.msk [vmem:[#allocation4] sm:$0x1] %vm398_vm9, %v397_v46 }
 0x128   : > { %s551_s27 = spop %550 }
 0x129   : > { %v418_v47 = vstv %s551_s27 }
 0x12a   : > { %419 = vst.msk [vmem:[#allocation6] sm:$0x1] %vm398_vm9, %v418_v47 }
 0x12b PF: > { %p776_p7 = scmp.eq.s32.totalorder %s529_s15, 1  ;;  %s429_s4 = sshll.u32 %s809_s2, 4  ;;  %s430_s4 = int_to_ptr.hbm [resolvable:$true] %s429_s4 }
 0x12c   : > { %s688_s5 = smov [#allocation4]   ;;  %s689_s7 = smov [#allocation6]  }
 0x12d   : > { %s427_s6 = sshll.u32 %s688_s5, 4  ;;  %s440_s8 = sshll.u32 %s689_s7, 4  ;;  %s428_s6 = int_to_ptr.vmem [resolvable:$true] %s427_s6  ;;  %s441_s8 = int_to_ptr.vmem [resolvable:$true] %s440_s8 }
 0x12e   : > { %553 = dma.vmem_to_hbm [thread:$0]  (%p776_p7), %s428_s6, 16, %s430_s4, [#allocation5]  }
 0x12f   : > { %s442_s11 = sshll.u32 %s810_s3, 4  ;;  %s443_s11 = int_to_ptr.hbm [resolvable:$true] %s442_s11 }
 0x130   : > { %555 = dma.vmem_to_hbm [thread:$0]  (%p776_p7), %s441_s8, 16, %s443_s11, [#allocation7]  }
 0x131   : > { %667 = dma.done.wait (%p776_p7), [#allocation5], 16  }
 0x132   : > { %669 = vsyncadd (%p776_p7), [#allocation5], 4294967280 }
 0x133   : > { %671 = dma.done.wait (%p776_p7), [#allocation7], 16  }
 0x134   : > { %673 = vsyncadd (%p776_p7), [#allocation7], 4294967280 }
 0x135 PF: > { %s16_s14 = sadd.s32 1, %s684_s14   ;;  %s814_s12 = smov %s680_s13 }
 0x136   : > { %p13_p8 = scmp.ge.s32.totalorder %s16_s14, 4   ;;  %s815_s13 = smov %s817_s16 }
 0x138   :  { %15 = sbr.rel (!%p13_p8) target bundleno = 3 (0x3), region = 76 }
 0x13d   :  { %461 = vsyncpa [#allocation5], 1 }
 0x13e   :  { %463 = vsyncpa [#allocation5 + $0x1], 1 }
 0x13f   :  { %464 = vsyncpa [#allocation7], 1 }

</bundles_post_ra>
